<compile_context>
chip_gen: v6e
topology: v6e:2x2x1
jax: 0.10.0
libtpu: 0.0.40
codegen_flags: <defaults>
</compile_context>

<pallas_src>
import functools
import math

import jax
import jax.numpy as jnp
from jax.experimental import pallas as pl
from jax.experimental.pallas import tpu as pltpu


# -----------------------------------------------------------------------------
# Fixed positional-embedding tables (tiny, plain-JAX glue)
# -----------------------------------------------------------------------------
def channel_embedding_pe(enc_in, d_model):
    assert d_model % 2 == 0, "ChannelEmbedding requires an even d_model"
    position = jnp.arange(enc_in, dtype=jnp.float32)[:, None]
    div_term = jnp.exp(jnp.arange(0, d_model, 2, dtype=jnp.float32)
                       * -(math.log(10000.0) / d_model))
    pe = jnp.zeros((enc_in, d_model), jnp.float32)
    pe = pe.at[:, 0::2].set(jnp.sin(position * div_term))
    pe = pe.at[:, 1::2].set(jnp.cos(position * div_term))
    return pe                                            # (enc_in, d_model)


def spatial_embedding_pe(coordinate, d_model):
    assert d_model % 4 == 0, "SpatialEmbedding requires d_model % 4 == 0"
    coord = coordinate - coordinate.mean(axis=0)
    px = coord[:, 0:1].astype(jnp.float32)
    py = coord[:, 1:2].astype(jnp.float32)
    div_term = jnp.exp(jnp.arange(0, d_model, 4, dtype=jnp.float32)
                       * -(math.log(10000.0) / d_model))
    n = coord.shape[0]
    pe = jnp.zeros((n, d_model), jnp.float32)
    pe = pe.at[:, 0::4].set(jnp.sin(px * div_term))
    pe = pe.at[:, 1::4].set(jnp.cos(px * div_term))
    pe = pe.at[:, 2::4].set(jnp.sin(py * div_term))
    pe = pe.at[:, 3::4].set(jnp.cos(py * div_term))
    return pe                                            # (N, d_model)


# -----------------------------------------------------------------------------
# Small helpers
# -----------------------------------------------------------------------------
def _ceil_div(a, b):
    return -(-a // b)


def _round_up(x, m):
    return _ceil_div(x, m) * m


def _pad_to(a, shape):
    pads = [(0, s - d) for d, s in zip(a.shape, shape)]
    if all(p == (0, 0) for p in pads):
        return a
    return jnp.pad(a, pads)


def _padded_bytes(shape, dtype):
    """VMEM footprint of ONE buffer of a block, with (sublane, 128-lane) padding."""
    itemsize = jnp.dtype(dtype).itemsize
    sub = {4: 8, 2: 16, 1: 32}.get(itemsize, 8)
    if len(shape) == 1:
        shape = (1,) + tuple(shape)
    *lead, r, c = shape
    r_p = _round_up(max(int(r), 1), sub)
    c_p = _round_up(max(int(c), 1), 128)
    lead_n = 1
    for d in lead:
        lead_n *= max(int(d), 1)
    return lead_n * r_p * c_p * itemsize


def _vmem_capacity_bytes():
    try:
        return int(pltpu.get_tpu_info().vmem_capacity_bytes)
    except Exception:
        pass
    try:
        kind = jax.devices()[0].device_kind.lower()
        if "v7" in kind:
            return 64 << 20
    except Exception:
        pass
    return 128 << 20


def _use_bf16_tail():
    """bf16 elementwise tail only where the VPU/EUP support bf16 (v6e/v7x)."""
    try:
        kind = jax.devices()[0].device_kind.lower()
        return not any(t in kind for t in ("v2", "v3", "v4", "v5"))
    except Exception:
        return True


def _vmem_estimate(tmv, tmf, c_in, Kf, D, out_dtype):
    """Sum of padded block footprints (default double buffering everywhere)."""
    bf16, f32 = jnp.bfloat16, jnp.float32
    est = 0
    est += 2 * _padded_bytes((tmv, c_in), bf16)          # value-row tile
    est += 2 * _padded_bytes((tmf, Kf), bf16)            # fore-row tile
    est += 2 * _padded_bytes((tmv, D), bf16)             # pe_v tile
    est += 2 * _padded_bytes((tmf, D), bf16)             # pe_f tile
    est += 2 * _padded_bytes((tmv, D), out_dtype)        # out_v tile
    est += 2 * _padded_bytes((tmf, D), out_dtype)        # out_f tile
    est += 2 * (_padded_bytes((c_in, D), bf16) + _padded_bytes((Kf, D), bf16)
                + 2 * _padded_bytes((D, D), bf16)
                + 2 * _padded_bytes((1, D), f32))        # resident weights/biases
    return est


def _choose_tiling(Rv, Rf, B, c_in, Kf, D, out_dtype, target_rows, budget):
    nj = max(1, _ceil_div(Rv, target_rows))
    if B * nj < 2 and Rv > 16:
        nj = 2  # >= 2 grid steps so both v7x TensorCores get work
    while True:
        tmv = _round_up(_ceil_div(Rv, nj), 16)
        tmf = _round_up(_ceil_div(Rf, nj), 16)
        est = _vmem_estimate(tmv, tmf, c_in, Kf, D, out_dtype)
        if est <= budget or tmv <= 16:
            return nj, tmv, tmf, est
        nj *= 2


# -----------------------------------------------------------------------------
# Pallas kernel: both embedding MLPs + PE add, fused per grid step
# -----------------------------------------------------------------------------
def _embed_kernel(xv_ref, xf_ref, pev_ref, pef_ref,
                  vw1_ref, vb1_ref, vw2_ref,
                  fw1_ref, fb1_ref, fw2_ref,
                  ov_ref, of_ref, *, tail_dtype):
    def branch(x_ref, pe_ref, w1_ref, b1_ref, w2_ref, o_ref):
        # f32 accumulation on the MXU; bias add in f32 before the activation.
        h = jnp.dot(x_ref[...], w1_ref[...],
                    preferred_element_type=jnp.float32) + b1_ref[...]
        # tanh GELU -> EUP slot; tail in bf16 on chips with bf16 VPU/EUP.
        h = jax.nn.gelu(h.astype(tail_dtype), approximate=True)
        y = jnp.dot(h.astype(w2_ref.dtype), w2_ref[...],
                    preferred_element_type=jnp.float32)
        # PE table already contains the second-layer bias (folded in wrapper).
        o_ref[...] = (y.astype(tail_dtype)
                      + pe_ref[...].astype(tail_dtype)).astype(o_ref.dtype)

    branch(xv_ref, pev_ref, vw1_ref, vb1_ref, vw2_ref, ov_ref)
    branch(xf_ref, pef_ref, fw1_ref, fb1_ref, fw2_ref, of_ref)


def fused_embed(xv, xf, pe_v, pe_f, vw1, vb1, vw2, fw1, fb1, fw2,
                *, out_dtype=jnp.bfloat16, target_rows=None):
    """xv: (B, Rv, c_in) bf16, xf: (B, Rf, 48) bf16 row-flattened inputs.
    pe_v: (Rv, D), pe_f: (Rf, D) bf16 additive tables (bias2 folded, shared
    across batch).  Weights already lane-padded (D % 128 == 0) and bf16.
    Returns ((B, Rv, D), (B, Rf, D)) in out_dtype."""
    B, Rv, c_in = xv.shape
    _, Rf, Kf = xf.shape
    D = vw1.shape[1]
    assert D % 128 == 0

    vmem_phys = _vmem_capacity_bytes()
    cap = int(vmem_phys * 0.85)              # headroom for Mosaic internal scratch
    headroom = 6 << 20
    if target_rows is None:
        target_rows = 2048 if vmem_phys >= (96 << 20) else 1024

    nj, tmv, tmf, est = _choose_tiling(Rv, Rf, B, c_in, Kf, D,
                                       out_dtype, target_rows, cap - headroom)
    Rv_pad, Rf_pad = nj * tmv, nj * tmf
    if Rv_pad != Rv:
        xv = jnp.pad(xv, ((0, 0), (0, Rv_pad - Rv), (0, 0)))
        pe_v = jnp.pad(pe_v, ((0, Rv_pad - Rv), (0, 0)))
    if Rf_pad != Rf:
        xf = jnp.pad(xf, ((0, 0), (0, Rf_pad - Rf), (0, 0)))
        pe_f = jnp.pad(pe_f, ((0, Rf_pad - Rf), (0, 0)))

    vmem_limit = int(min(max(est + headroom, 32 << 20), cap))
    tail_dtype = jnp.bfloat16 if _use_bf16_tail() else jnp.float32

    # Grid ordered (row_tile, batch): batch is the fastest axis, so the PE and
    # weight blocks keep the same block index across it and are not re-fetched.
    grid = (nj, B)
    resident = lambda j, b: (0, 0)

    out_v, out_f = pl.pallas_call(
        functools.partial(_embed_kernel, tail_dtype=tail_dtype),
        out_shape=(jax.ShapeDtypeStruct((B, Rv_pad, D), out_dtype),
                   jax.ShapeDtypeStruct((B, Rf_pad, D), out_dtype)),
        grid=grid,
        in_specs=[
            pl.BlockSpec((None, tmv, c_in), lambda j, b: (b, j, 0)),  # value rows
            pl.BlockSpec((None, tmf, Kf), lambda j, b: (b, j, 0)),    # fore rows
            pl.BlockSpec((tmv, D), lambda j, b: (j, 0)),              # pe (value)
            pl.BlockSpec((tmf, D), lambda j, b: (j, 0)),              # pe (fore)
            pl.BlockSpec((c_in, D), resident),                        # value W1
            pl.BlockSpec((1, D), resident),                           # value b1
            pl.BlockSpec((D, D), resident),                           # value W2
            pl.BlockSpec((Kf, D), resident),                          # fore W1
            pl.BlockSpec((1, D), resident),                           # fore b1
            pl.BlockSpec((D, D), resident),                           # fore W2
        ],
        out_specs=(
            pl.BlockSpec((None, tmv, D), lambda j, b: (b, j, 0)),
            pl.BlockSpec((None, tmf, D), lambda j, b: (b, j, 0)),
        ),
        compiler_params=pltpu.CompilerParams(
            dimension_semantics=("parallel", "parallel"),
            vmem_limit_bytes=vmem_limit),
    )(xv, xf, pe_v, pe_f, vw1, vb1, vw2, fw1, fb1, fw2)

    return out_v[:, :Rv], out_f[:, :Rf]


# -----------------------------------------------------------------------------
# DataEmbedding_st forward (coordinate + fore_x branch)
# -----------------------------------------------------------------------------
def init_params(key, c_in, d_model):
    ks = jax.random.split(key, 8)
    s = 0.02
    return {
        "v_w1": jax.random.normal(ks[0], (c_in, d_model), jnp.float32) * s,
        "v_b1": jax.random.normal(ks[1], (d_model,), jnp.float32) * s,
        "v_w2": jax.random.normal(ks[2], (d_model, d_model), jnp.float32) * s,
        "v_b2": jax.random.normal(ks[3], (d_model,), jnp.float32) * s,
        "f_w1": jax.random.normal(ks[4], (48, d_model), jnp.float32) * s,
        "f_b1": jax.random.normal(ks[5], (d_model,), jnp.float32) * s,
        "f_w2": jax.random.normal(ks[6], (d_model, d_model), jnp.float32) * s,
        "f_b2": jax.random.normal(ks[7], (d_model,), jnp.float32) * s,
    }


@functools.partial(jax.jit, static_argnames=("out_dtype",))
def data_embedding_st_forward(params, x, fore_x, coordinate, *,
                              out_dtype=jnp.bfloat16):
    """x: (B, N, c_in, T) with T == enc_in; fore_x: (B, N, 48, T-7);
    coordinate: (N, 2).  Returns (x_emb, fore_emb, spatial_pe)."""
    B, N, c_in, T = x.shape
    Fm = fore_x.shape[3]                               # == T - 7
    D = params["v_w1"].shape[1]
    D_pad = _round_up(D, 128)                          # lane-dense output stores

    ch_pe = channel_embedding_pe(T, D)                 # (T, D)
    sp_pe = spatial_embedding_pe(coordinate, D)        # (N, D)

    bf16 = jnp.bfloat16
    # Combined additive tables (batch-independent), with the second-layer bias
    # folded in so the kernel tail has one fewer broadcast add per step.
    pe_v = (sp_pe[:, None, :] + ch_pe[None, :, :]
            + params["v_b2"][None, None, :]).reshape(N * T, D)
    pe_f = (sp_pe[:, None, :] + ch_pe[7:][None, :, :]
            + params["f_b2"][None, None, :]).reshape(N * Fm, D)
    pe_v = _pad_to(pe_v, (N * T, D_pad)).astype(bf16)
    pe_f = _pad_to(pe_f, (N * Fm, D_pad)).astype(bf16)

    # Zero-padding d_model is exact: padded W1 cols / b1 give h_pad = GELU(0)=0,
    # and padded W2 rows/cols contribute 0 to the valid output columns.
    vw1 = _pad_to(params["v_w1"], (c_in, D_pad)).astype(bf16)
    vw2 = _pad_to(params["v_w2"], (D_pad, D_pad)).astype(bf16)
    vb1 = _pad_to(params["v_b1"], (D_pad,)).reshape(1, D_pad).astype(jnp.float32)
    fw1 = _pad_to(params["f_w1"], (48, D_pad)).astype(bf16)
    fw2 = _pad_to(params["f_w2"], (D_pad, D_pad)).astype(bf16)
    fb1 = _pad_to(params["f_b1"], (D_pad,)).reshape(1, D_pad).astype(jnp.float32)

    # permute(0, 1, 3, 2) + row-flatten; bf16 streaming into the kernel.
    xv = jnp.transpose(x, (0, 1, 3, 2)).reshape(B, N * T, c_in).astype(bf16)
    xf = jnp.transpose(fore_x, (0, 1, 3, 2)).reshape(B, N * Fm, 48).astype(bf16)

    out_v, out_f = fused_embed(xv, xf, pe_v, pe_f,
                               vw1, vb1, vw2, fw1, fb1, fw2,
                               out_dtype=out_dtype)
    x_emb = out_v[:, :, :D].reshape(B, N, T, D)
    fore_emb = out_f[:, :, :D].reshape(B, N, Fm, D)

    # TODO(synk): dropout is identity here (inference); training-mode dropout
    # would need pltpu.prng_random_bits masking inside the kernel.
    return x_emb, fore_emb, sp_pe[None, :, :]          # spatial pe: (1, N, d_model)


# -----------------------------------------------------------------------------
# Pure-JAX f32 reference (PyTorch semantics: exact erf GELU, f32 everywhere)
# -----------------------------------------------------------------------------
def _reference_forward(params, x, fore_x, coordinate):
    B, N, c_in, T = x.shape
    D = params["v_w1"].shape[1]
    ch_pe = channel_embedding_pe(T, D)
    sp_pe = spatial_embedding_pe(coordinate, D)

    def mlp(z, w1, b1, w2, b2):
        h = jax.nn.gelu(z @ w1 + b1, approximate=False)
        return h @ w2 + b2

    v = mlp(jnp.transpose(x, (0, 1, 3, 2)),
            params["v_w1"], params["v_b1"], params["v_w2"], params["v_b2"])
    v = v + ch_pe[None, None] + sp_pe[None, :, None, :]
    f = mlp(jnp.transpose(fore_x, (0, 1, 3, 2)),
            params["f_w1"], params["f_b1"], params["f_w2"], params["f_b2"])
    f = f + ch_pe[7:][None, None] + sp_pe[None, :, None, :]
    return v, f, sp_pe[None]


# -----------------------------------------------------------------------------
if __name__ == "__main__":
    key = jax.random.PRNGKey(0)
    k_x, k_f, k_c, k_p = jax.random.split(key, 4)

    B, N, c_in, enc_in, d_model = 2, 4, 8, 16, 32
    fore_len = enc_in - 7                              # implied by pe[:, 7:, :]

    x = jax.random.normal(k_x, (B, N, c_in, enc_in), jnp.float32)
    fore_x = jax.random.normal(k_f, (B, N, 48, fore_len), jnp.float32)
    coordinate = jax.random.normal(k_c, (N, 2), jnp.float32) * 10.0
    params = init_params(k_p, c_in, d_model)

    x_emb, fore_emb, sp_pe = data_embedding_st_forward(params, x, fore_x, coordinate)
    jax.block_until_ready((x_emb, fore_emb, sp_pe))

    # shape + numerical sanity (bf16 streaming + bf16 output + tanh GELU drift)
    assert x_emb.shape == (B, N, enc_in, d_model)
    assert fore_emb.shape == (B, N, fore_len, d_model)
    assert sp_pe.shape == (1, N, d_model)
    assert bool(jnp.all(jnp.isfinite(x_emb.astype(jnp.float32))))
    assert bool(jnp.all(jnp.isfinite(fore_emb.astype(jnp.float32))))

    ref_v, ref_f, ref_pe = _reference_forward(params, x, fore_x, coordinate)
    assert bool(jnp.allclose(x_emb.astype(jnp.float32), ref_v, atol=4e-2, rtol=4e-2))
    assert bool(jnp.allclose(fore_emb.astype(jnp.float32), ref_f, atol=4e-2, rtol=4e-2))
    assert bool(jnp.allclose(sp_pe, ref_pe, atol=1e-5, rtol=1e-5))

    print("KERNEL_OK")
</pallas_src>

<mosaic_0001>
module attributes {stable_mosaic.version = 11 : i64} {
  func.func @_embed_kernel(%arg0: i32, %arg1: i32, %arg2: memref<1x64x8xbf16, #tpu.memory_space<vmem>>, %arg3: memref<1x48x48xbf16, #tpu.memory_space<vmem>>, %arg4: memref<64x128xbf16, #tpu.memory_space<vmem>>, %arg5: memref<48x128xbf16, #tpu.memory_space<vmem>>, %arg6: memref<8x128xbf16, #tpu.memory_space<vmem>>, %arg7: memref<1x128xf32, #tpu.memory_space<vmem>>, %arg8: memref<128x128xbf16, #tpu.memory_space<vmem>>, %arg9: memref<48x128xbf16, #tpu.memory_space<vmem>>, %arg10: memref<1x128xf32, #tpu.memory_space<vmem>>, %arg11: memref<128x128xbf16, #tpu.memory_space<vmem>>, %arg12: memref<1x64x128xbf16, #tpu.memory_space<vmem>>, %arg13: memref<1x48x128xbf16, #tpu.memory_space<vmem>>) attributes {dimension_semantics = [#tpu.dimension_semantics<parallel>, #tpu.dimension_semantics<parallel>], iteration_bounds = array<i64: 1, 2>, scalar_prefetch = 0 : i64, scratch_operands = 0 : i64, tpu.core_type = #tpu.core_type<tc>, window_params = [{transform_indices = @transform_0, window_bounds = array<i64: 1, 64, 8>}, {transform_indices = @transform_1, window_bounds = array<i64: 1, 48, 48>}, {transform_indices = @transform_2, window_bounds = array<i64: 64, 128>}, {transform_indices = @transform_3, window_bounds = array<i64: 48, 128>}, {pipeline_mode = #tpu.pipeline_mode<synchronous>, transform_indices = @transform_4, window_bounds = array<i64: 8, 128>}, {pipeline_mode = #tpu.pipeline_mode<synchronous>, transform_indices = @transform_5, window_bounds = array<i64: 1, 128>}, {pipeline_mode = #tpu.pipeline_mode<synchronous>, transform_indices = @transform_6, window_bounds = array<i64: 128, 128>}, {pipeline_mode = #tpu.pipeline_mode<synchronous>, transform_indices = @transform_7, window_bounds = array<i64: 48, 128>}, {pipeline_mode = #tpu.pipeline_mode<synchronous>, transform_indices = @transform_8, window_bounds = array<i64: 1, 128>}, {pipeline_mode = #tpu.pipeline_mode<synchronous>, transform_indices = @transform_9, window_bounds = array<i64: 128, 128>}, {transform_indices = @transform_10, window_bounds = array<i64: 1, 64, 128>}, {transform_indices = @transform_11, window_bounds = array<i64: 1, 48, 128>}]} {
    %c0 = arith.constant 0 : index
    %c0_0 = arith.constant 0 : index
    %c0_1 = arith.constant 0 : index
    %0 = vector.load %arg2[%c0, %c0_0, %c0_1] : memref<1x64x8xbf16, #tpu.memory_space<vmem>>, vector<1x64x8xbf16>
    %1 = vector.shape_cast %0 : vector<1x64x8xbf16> to vector<64x8xbf16>
    %c0_2 = arith.constant 0 : index
    %c0_3 = arith.constant 0 : index
    %2 = vector.load %arg6[%c0_2, %c0_3] : memref<8x128xbf16, #tpu.memory_space<vmem>>, vector<8x128xbf16>
    %cst = arith.constant dense<0.000000e+00> : vector<64x128xf32>
    %3 = tpu.matmul %1, %2, %cst {dimension_numbers = #tpu.dot_dimension_numbers<[1], [0], [0], [1], [0, 0, 1, 1], [], []>} : vector<64x8xbf16>, vector<8x128xbf16>, vector<64x128xf32> -> vector<64x128xf32>
    %c0_4 = arith.constant 0 : index
    %c0_5 = arith.constant 0 : index
    %4 = vector.load %arg7[%c0_4, %c0_5] : memref<1x128xf32, #tpu.memory_space<vmem>>, vector<1x128xf32>
    %5 = vector.broadcast %4 : vector<1x128xf32> to vector<64x128xf32>
    %6 = arith.addf %3, %5 : vector<64x128xf32>
    %7 = arith.truncf %6 : vector<64x128xf32> to vector<64x128xbf16>
    %8 = arith.mulf %7, %7 : vector<64x128xbf16>
    %9 = arith.mulf %7, %8 : vector<64x128xbf16>
    %cst_6 = arith.constant 4.467770e-02 : bf16
    %10 = vector.broadcast %cst_6 : bf16 to vector<64x128xbf16>
    %11 = arith.mulf %10, %9 : vector<64x128xbf16>
    %12 = arith.addf %7, %11 : vector<64x128xbf16>
    %cst_7 = arith.constant 7.968750e-01 : bf16
    %13 = vector.broadcast %cst_7 : bf16 to vector<64x128xbf16>
    %14 = arith.mulf %13, %12 : vector<64x128xbf16>
    %15 = math.tanh %14 : vector<64x128xbf16>
    %cst_8 = arith.constant 1.000000e+00 : bf16
    %16 = vector.broadcast %cst_8 : bf16 to vector<64x128xbf16>
    %17 = arith.addf %16, %15 : vector<64x128xbf16>
    %cst_9 = arith.constant 5.000000e-01 : bf16
    %18 = vector.broadcast %cst_9 : bf16 to vector<64x128xbf16>
    %19 = arith.mulf %18, %17 : vector<64x128xbf16>
    %20 = arith.mulf %7, %19 : vector<64x128xbf16>
    %c0_10 = arith.constant 0 : index
    %c0_11 = arith.constant 0 : index
    %21 = vector.load %arg8[%c0_10, %c0_11] : memref<128x128xbf16, #tpu.memory_space<vmem>>, vector<128x128xbf16>
    %cst_12 = arith.constant dense<0.000000e+00> : vector<64x128xf32>
    %22 = tpu.matmul %20, %21, %cst_12 {dimension_numbers = #tpu.dot_dimension_numbers<[1], [0], [0], [1], [0, 0, 1, 1], [], []>} : vector<64x128xbf16>, vector<128x128xbf16>, vector<64x128xf32> -> vector<64x128xf32>
    %23 = arith.truncf %22 : vector<64x128xf32> to vector<64x128xbf16>
    %c0_13 = arith.constant 0 : index
    %c0_14 = arith.constant 0 : index
    %24 = vector.load %arg4[%c0_13, %c0_14] : memref<64x128xbf16, #tpu.memory_space<vmem>>, vector<64x128xbf16>
    %25 = arith.addf %23, %24 : vector<64x128xbf16>
    %c0_15 = arith.constant 0 : index
    %c0_16 = arith.constant 0 : index
    %c0_17 = arith.constant 0 : index
    %26 = vector.load %arg12[%c0_15, %c0_16, %c0_17] : memref<1x64x128xbf16, #tpu.memory_space<vmem>>, vector<1x64x128xbf16>
    %27 = vector.shape_cast %26 : vector<1x64x128xbf16> to vector<64x128xbf16>
    %28 = vector.shape_cast %25 : vector<64x128xbf16> to vector<1x64x128xbf16>
    tpu.vector_store %arg12[%c0_15, %c0_16, %c0_17], %28 {strides = array<i32>} : memref<1x64x128xbf16, #tpu.memory_space<vmem>>, vector<1x64x128xbf16>,
    %c0_18 = arith.constant 0 : index
    %c0_19 = arith.constant 0 : index
    %c0_20 = arith.constant 0 : index
    %29 = vector.load %arg3[%c0_18, %c0_19, %c0_20] : memref<1x48x48xbf16, #tpu.memory_space<vmem>>, vector<1x48x48xbf16>
    %30 = vector.shape_cast %29 : vector<1x48x48xbf16> to vector<48x48xbf16>
    %c0_21 = arith.constant 0 : index
    %c0_22 = arith.constant 0 : index
    %31 = vector.load %arg9[%c0_21, %c0_22] : memref<48x128xbf16, #tpu.memory_space<vmem>>, vector<48x128xbf16>
    %cst_23 = arith.constant dense<0.000000e+00> : vector<48x128xf32>
    %32 = tpu.matmul %30, %31, %cst_23 {dimension_numbers = #tpu.dot_dimension_numbers<[1], [0], [0], [1], [0, 0, 1, 1], [], []>} : vector<48x48xbf16>, vector<48x128xbf16>, vector<48x128xf32> -> vector<48x128xf32>
    %c0_24 = arith.constant 0 : index
    %c0_25 = arith.constant 0 : index
    %33 = vector.load %arg10[%c0_24, %c0_25] : memref<1x128xf32, #tpu.memory_space<vmem>>, vector<1x128xf32>
    %34 = vector.broadcast %33 : vector<1x128xf32> to vector<48x128xf32>
    %35 = arith.addf %32, %34 : vector<48x128xf32>
    %36 = arith.truncf %35 : vector<48x128xf32> to vector<48x128xbf16>
    %37 = arith.mulf %36, %36 : vector<48x128xbf16>
    %38 = arith.mulf %36, %37 : vector<48x128xbf16>
    %cst_26 = arith.constant 4.467770e-02 : bf16
    %39 = vector.broadcast %cst_26 : bf16 to vector<48x128xbf16>
    %40 = arith.mulf %39, %38 : vector<48x128xbf16>
    %41 = arith.addf %36, %40 : vector<48x128xbf16>
    %cst_27 = arith.constant 7.968750e-01 : bf16
    %42 = vector.broadcast %cst_27 : bf16 to vector<48x128xbf16>
    %43 = arith.mulf %42, %41 : vector<48x128xbf16>
    %44 = math.tanh %43 : vector<48x128xbf16>
    %cst_28 = arith.constant 1.000000e+00 : bf16
    %45 = vector.broadcast %cst_28 : bf16 to vector<48x128xbf16>
    %46 = arith.addf %45, %44 : vector<48x128xbf16>
    %cst_29 = arith.constant 5.000000e-01 : bf16
    %47 = vector.broadcast %cst_29 : bf16 to vector<48x128xbf16>
    %48 = arith.mulf %47, %46 : vector<48x128xbf16>
    %49 = arith.mulf %36, %48 : vector<48x128xbf16>
    %c0_30 = arith.constant 0 : index
    %c0_31 = arith.constant 0 : index
    %50 = vector.load %arg11[%c0_30, %c0_31] : memref<128x128xbf16, #tpu.memory_space<vmem>>, vector<128x128xbf16>
    %cst_32 = arith.constant dense<0.000000e+00> : vector<48x128xf32>
    %51 = tpu.matmul %49, %50, %cst_32 {dimension_numbers = #tpu.dot_dimension_numbers<[1], [0], [0], [1], [0, 0, 1, 1], [], []>} : vector<48x128xbf16>, vector<128x128xbf16>, vector<48x128xf32> -> vector<48x128xf32>
    %52 = arith.truncf %51 : vector<48x128xf32> to vector<48x128xbf16>
    %c0_33 = arith.constant 0 : index
    %c0_34 = arith.constant 0 : index
    %53 = vector.load %arg5[%c0_33, %c0_34] : memref<48x128xbf16, #tpu.memory_space<vmem>>, vector<48x128xbf16>
    %54 = arith.addf %52, %53 : vector<48x128xbf16>
    %c0_35 = arith.constant 0 : index
    %c0_36 = arith.constant 0 : index
    %c0_37 = arith.constant 0 : index
    %55 = vector.load %arg13[%c0_35, %c0_36, %c0_37] : memref<1x48x128xbf16, #tpu.memory_space<vmem>>, vector<1x48x128xbf16>
    %56 = vector.shape_cast %55 : vector<1x48x128xbf16> to vector<48x128xbf16>
    %57 = vector.shape_cast %54 : vector<48x128xbf16> to vector<1x48x128xbf16>
    tpu.vector_store %arg13[%c0_35, %c0_36, %c0_37], %57 {strides = array<i32>} : memref<1x48x128xbf16, #tpu.memory_space<vmem>>, vector<1x48x128xbf16>,
    return
  }
  func.func @transform_0(%arg0: i32, %arg1: i32) -> (i32, i32, i32) {
    %c0_i32 = arith.constant 0 : i32
    %c0_i32_0 = arith.constant 0 : i32
    return %arg1, %arg0, %c0_i32 : i32, i32, i32
  }
  func.func @transform_1(%arg0: i32, %arg1: i32) -> (i32, i32, i32) {
    %c0_i32 = arith.constant 0 : i32
    %c0_i32_0 = arith.constant 0 : i32
    return %arg1, %arg0, %c0_i32 : i32, i32, i32
  }
  func.func @transform_2(%arg0: i32, %arg1: i32) -> (i32, i32) {
    %c0_i32 = arith.constant 0 : i32
    %c0_i32_0 = arith.constant 0 : i32
    return %arg0, %c0_i32 : i32, i32
  }
  func.func @transform_3(%arg0: i32, %arg1: i32) -> (i32, i32) {
    %c0_i32 = arith.constant 0 : i32
    %c0_i32_0 = arith.constant 0 : i32
    return %arg0, %c0_i32 : i32, i32
  }
  func.func @transform_4(%arg0: i32, %arg1: i32) -> (i32, i32) {
    %c0_i32 = arith.constant 0 : i32
    %c0_i32_0 = arith.constant 0 : i32
    %c0_i32_1 = arith.constant 0 : i32
    return %c0_i32, %c0_i32_0 : i32, i32
  }
  func.func @transform_5(%arg0: i32, %arg1: i32) -> (i32, i32) {
    %c0_i32 = arith.constant 0 : i32
    %c0_i32_0 = arith.constant 0 : i32
    %c0_i32_1 = arith.constant 0 : i32
    return %c0_i32, %c0_i32_0 : i32, i32
  }
  func.func @transform_6(%arg0: i32, %arg1: i32) -> (i32, i32) {
    %c0_i32 = arith.constant 0 : i32
    %c0_i32_0 = arith.constant 0 : i32
    %c0_i32_1 = arith.constant 0 : i32
    return %c0_i32, %c0_i32_0 : i32, i32
  }
  func.func @transform_7(%arg0: i32, %arg1: i32) -> (i32, i32) {
    %c0_i32 = arith.constant 0 : i32
    %c0_i32_0 = arith.constant 0 : i32
    %c0_i32_1 = arith.constant 0 : i32
    return %c0_i32, %c0_i32_0 : i32, i32
  }
  func.func @transform_8(%arg0: i32, %arg1: i32) -> (i32, i32) {
    %c0_i32 = arith.constant 0 : i32
    %c0_i32_0 = arith.constant 0 : i32
    %c0_i32_1 = arith.constant 0 : i32
    return %c0_i32, %c0_i32_0 : i32, i32
  }
  func.func @transform_9(%arg0: i32, %arg1: i32) -> (i32, i32) {
    %c0_i32 = arith.constant 0 : i32
    %c0_i32_0 = arith.constant 0 : i32
    %c0_i32_1 = arith.constant 0 : i32
    return %c0_i32, %c0_i32_0 : i32, i32
  }
  func.func @transform_10(%arg0: i32, %arg1: i32) -> (i32, i32, i32) {
    %c0_i32 = arith.constant 0 : i32
    %c0_i32_0 = arith.constant 0 : i32
    return %arg1, %arg0, %c0_i32 : i32, i32, i32
  }
  func.func @transform_11(%arg0: i32, %arg1: i32) -> (i32, i32, i32) {
    %c0_i32 = arith.constant 0 : i32
    %c0_i32_0 = arith.constant 0 : i32
    return %arg1, %arg0, %c0_i32 : i32, i32, i32
  }
}

</mosaic_0001>

<bundles_post_ra>
// kernel: data_embedding_st_forward.1
= control target key start
LH: loop header
LB: loop body
LE: loop exit
PB: predicated region body
PF: predicated region fallthrough
CT: control target
= control target key end

     0   :  { %s2155_s0 = inlined_call_operand.vmem [shape: bf16[2,64,8], index: 0, kind: input, shape index: {}]   ;;  %s2156_s1 = inlined_call_operand.vmem [shape: bf16[2,48,48], index: 1, kind: input, shape index: {}]   ;;  %s2157_s2 = inlined_call_operand.vmem [shape: bf16[64,128], index: 2, kind: input, shape index: {}]   ;;  %s2158_s3 = inlined_call_operand.vmem [shape: bf16[48,128], index: 3, kind: input, shape index: {}]   ;;  %s2159_s4 = inlined_call_operand.vmem [shape: bf16[8,128], index: 4, kind: input, shape index: {}]   ;;  %s2160_s5 = inlined_call_operand.vmem [shape: f32[1,128], index: 5, kind: input, shape index: {}]   ;;  %s2161_s6 = inlined_call_operand.vmem [shape: bf16[128,128], index: 6, kind: input, shape index: {}]   ;;  %s2162_s7 = inlined_call_operand.vmem [shape: bf16[48,128], index: 7, kind: input, shape index: {}]   ;;  %s2163_s8 = inlined_call_operand.vmem [shape: f32[1,128], index: 8, kind: input, shape index: {}]   ;;  %s2164_s9 = inlined_call_operand.vmem [shape: bf16[128,128], index: 9, kind: input, shape index: {}]   ;;  %s2165_s10 = inlined_call_operand.hbm [shape: bf16[2,64,128], index: 10, kind: output, shape index: {0}]   ;;  %s2166_s11 = inlined_call_operand.vmem [shape: bf16[2,48,128], index: 11, kind: output, shape index: {1}]  }
   0x1   :  { %2168 = sst [smem:[#allocation5_spill]] %s2155_s0 }
   0x2   :  { %2169 = sst [smem:[#allocation6_spill]] %s2156_s1 }
   0x3   :  { %2170 = sst [smem:[#allocation7_spill]] %s2157_s2 }
   0x4   :  { %17 = vsyncpa [#allocation3], 0 }
   0x5   :  { %19 = vsyncpa [#allocation3 + $0x1], 0  ;;  %s1848_s17 = smov 0   ;;  %s1850_s18 = smov 0  }
   0x6   :  { %s1852_s19 = smov 0   ;;  %s1854_s20 = smov 0  }
   0x7   :  { %s1856_s21 = smov 0   ;;  %s1858_s22 = smov 0  }
   0x8 LB: > { %s1408_s23 = sadd.s32 4294967295, %s1781_s22   ;;  %s1409_s24 = sadd.s32 4294967294, %s1781_s22   ;;  %s1781_s22 = sphi %s1858_s22, %s25_s22   ;;  %s1777_s21 = sphi %s1856_s21, %s2181_s21   ;;  %s1773_s20 = sphi %s1854_s20, %s2180_s20   ;;  %s1769_s19 = sphi %s1852_s19, %s2179_s19   ;;  %s1765_s18 = sphi %s1850_s18, %s2178_s18   ;;  %s1761_s17 = sphi %s1848_s17, %s2177_s17  }
   0x9   : > { %s34_s25 = sadd.s32 1, %s1777_s21  ;;  %s280_s26 = sadd.s32 1, %s1769_s19 }
   0xa   : > { %p35_p0 = scmp.ge.s32.totalorder %s34_s25, 2  ;;  %p290_p1 = scmp.ne.s32.totalorder %s1769_s19, %s1765_s18 }
   0xb   : > { %p291_p2 = scmp.eq.s32.totalorder %s1408_s23, 1  ;;  %p296_p3 = scmp.ne.s32.totalorder %s1765_s18, %s1761_s17 }
   0xc   : > { %s2183_s25 = smov (%p35_p0, %s34_s25), 0  ;;  %p297_p5 = scmp.eq.s32.totalorder %s1409_s24, 1 }
   0xd   : > { %p1888_p4 = por %p291_p2, %p290_p1  ;;  %s275_s28 = ssub.s32 %s1777_s21, %s2183_s25 }
   0xe   : > { %p1414_p6 = scmp.ge.s32.totalorder %s1781_s22, 1  ;;  %p278_p7 = scmp.eq.s32.totalorder %s275_s28, 0 }
   0xf   : > { %p1895_p8 = por %p297_p5, %p296_p3  ;;  %p405_p9 = scmp.lt.s32.totalorder %s1781_s22, 3 }
  0x10   : > { %s1901_s30 = scalar_select %p278_p7, %s1769_s19, %s280_s26  }
  0x11   : > { %p406_p10 = pnand %p1414_p6, %p405_p9 }
  0x12   : > { %p478_p11 = scmp.lt.s32.totalorder (!%p406_p10), %s1773_s20, 1  ;;  %s2173_s0 = sld [smem:[#allocation5_spill]] (!%p406_p10) }
  0x13   : > { %409 = sbr.rel (%p406_p10) target bundleno = 499 (0x1f3), region = 60  ;;  %s2174_s1 = sld [smem:[#allocation6_spill]] (!%p406_p10) }
  0x14   : > { %s2175_s2 = sld [smem:[#allocation7_spill]] (!%p406_p10) }
  0x18   : > { %v1658_v0 = vld [vmem:[%s2162_s7 + $0x10] sm:$0xff]   ;;  %v1783_v1 = vmov 0.0   ;;  %v533_v2 = vld [vmem:[%s2159_s4] sm:$0xf]  ;;  %vm574_vm0 = vcmask 1043456   ;;  %v1659_v4 = vld [vmem:[%s2162_s7 + $0x8] sm:$0xff]  }
  0x19   : > { %1551 = vmatprep.subr.bf16.mxu0 %v1783_v1  ;;  %1597 = vmatprep.subr.msk.bf16.mxu1 %vm574_vm0, %v533_v2  ;;  %v576_v3 = vsel %vm574_vm0, %v533_v2, 0  ;;  %vm561_vm1 = vcmask 64512   ;;  %s1916_s24 = scalar_select %p478_p11, %s1773_s20, 1  ;;  %v1662_v5 = vld [vmem:[%s2162_s7] sm:$0xff]   ;;  %vm1784_vm2 = vmmov 0   ;;  %vm940_vm3 = vcmask 392192  }
  0x1a   : > { %1552 = vmatpush3.bf16.msra.mxu0 %v1658_v0  ;;  %1518 = vmatpush3.bf16.msra.mxu1 %v576_v3  ;;  %v1668_v13 = vld [vmem:[%s2161_s6 + $0x38] sm:$0xff]   ;;  %v1670_v15 = vld [vmem:[%s2161_s6 + $0x30] sm:$0xff]   ;;  %v1672_v17 = vld [vmem:[%s2161_s6 + $0x28] sm:$0xff]  }
  0x1b   : > { %1553 = vmatprep.subr.bf16.mxu0 %v1783_v1  ;;  %1557 = vmatprep.mubr.msk.bf16.mxu0 %vm1784_vm2, %v1783_v1  ;;  %s1481_s12 = sshll.u32 %s1916_s24, 5  ;;  %s2167_s13 = smul.u32 24, %s1916_s24  ;;  %v1669_v14 = vld [vmem:[%s2164_s9 + $0x38] sm:$0xff]   ;;  %v1671_v16 = vld [vmem:[%s2164_s9 + $0x30] sm:$0xff]   ;;  %v1673_v18 = vld [vmem:[%s2164_s9 + $0x28] sm:$0xff]  }
  0x1c   : > { %s485_s16 = scalar_lea.vmem %s2173_s0, %s1481_s12  ;;  %1527 = vmatprep.subr.bf16.mxu1 %v1668_v13  ;;  %v1674_v19 = vld [vmem:[%s2161_s6 + $0x20] sm:$0xff]   ;;  %v1676_v21 = vld [vmem:[%s2161_s6 + $0x18] sm:$0xff]   ;;  %v1678_v23 = vld [vmem:[%s2161_s6 + $0x10] sm:$0xff]   ;;  %s2176_s23 = smul.u32 24, %s1916_s24 }
  0x1d   : > { %v1660_v6 = vld [vmem:[%s485_s16] sm:$0xff]   ;;  %s495_s28 = scalar_lea.vmem %s2174_s1, %s2167_s13  ;;  %v1661_v7 = vld [vmem:[%s485_s16 + $0x8] sm:$0xff]   ;;  %v1664_v9 = vld [vmem:[%s485_s16 + $0x10] sm:$0xff]   ;;  %s463_s13 = sand.u32 1, %s1765_s18  }
  0x1e   : > { %1554 = vmatpush3.bf16.msra.mxu0 %v1659_v4  ;;  %1519 = vmatprep.mubr.msk.bf16.mxu1 %vm561_vm1, %v1660_v6  ;;  %v1663_v8 = vld [vmem:[%s495_s28] sm:$0xff]   ;;  %v1665_v10 = vld [vmem:[%s485_s16 + $0x18] sm:$0xff]   ;;  %v1666_v11 = vld [vmem:[%s495_s28 + $0x8] sm:$0xff]   ;;  %s1415_s14 = sshll.u32 %s463_s13, 5  ;;  %s2069_s1 = scalar_lea.vmem %s2166_s11, %s2176_s23 }
  0x1f   : > { %1555 = vmatprep.subr.bf16.mxu0 %v1783_v1  ;;  %1520 = vmatmul.mubr.msk.bf16.vlgmr.msra.gmra.mxu1 %vm561_vm1, %v1661_v7  ;;  %v1667_v12 = vld [vmem:[%s495_s28 + $0x10] sm:$0xff]   ;;  %v1675_v20 = vld [vmem:[%s2164_s9 + $0x20] sm:$0xff]   ;;  %v1677_v22 = vld [vmem:[%s2164_s9 + $0x18] sm:$0xff]   ;;  %s2073_s24 = scalar_lea.vmem [#allocation2], %s1415_s14  ;;  %s1482_s23 = sshll.u32 %s1773_s20, 9 }
  0x20   : > { %1523 = vmatprep.mubr.msk.bf16.mxu1 %vm561_vm1, %v1664_v9  ;;  %1528 = vmatpush3.bf16.msra.mxu1 %v1668_v13  ;;  %v1679_v24 = vld [vmem:[%s2164_s9 + $0x10] sm:$0xff]   ;;  %v1680_v25 = vld [vmem:[%s2161_s6 + $0x8] sm:$0xff]   ;;  %v1682_v27 = vld [vmem:[%s2161_s6] sm:$0xff]   ;;  %s1240_s26 = sshll.u32 %s2073_s24, 4  ;;  %s2100_s15 = scalar_lea.hbm %s2165_s10, %s1482_s23  ;;  %s2102_s26 = int_to_ptr.vmem [resolvable:$true] %s1240_s26 }
  0x21   : > { %1529 = vmatprep.subr.bf16.mxu1 %v1670_v15  ;;  %v1681_v26 = vld [vmem:[%s2164_s9 + $0x8] sm:$0xff]   ;;  %v1683_v28 = vld [vmem:[%s2164_s9] sm:$0xff]   ;;  %s2108_s14 = scalar_lea.sflag [#allocation3], %s463_s13  ;;  %s1705_s16 = scalar_lea.vmem %s2102_s26, 512 }
  0x22   : > { %1556 = vmatpush3.bf16.msra.mxu0 %v1662_v5  ;;  %v1420_v30 = vld [vmem:[%s2160_s5] ss:$0 sm:$0xff]  ;;  %p1706_p12 = scmp.ne.s32.totalorder %s2102_s26, %s1705_s16  ;;  %s1785_s23 = smov [#allocation2]  }
  0x23   : > { %1569 = vmatprep.subr.bf16.mxu0 %v1783_v1  ;;  %v1449_v35 = vld [vmem:[%s2163_s8] ss:$0 sm:$0xff]  ;;  %s1709_s0 = sshll.u32 %s1785_s23, 4  ;;  %s1710_s0 = int_to_ptr.vmem [resolvable:$false] %s1709_s0 }
  0x24   : > { %1530 = vmatpush3.bf16.msra.mxu1 %v1670_v15  ;;  %p1707_p13 = pnand %p1706_p12, %p1888_p4  ;;  %s1711_s28 = scalar_lea.vmem %s1710_s0, 1024 }
  0x25   : > { %1558 = vmatmul.mubr.msk.bf16.vlgmr.msra.gmra.mxu0 %vm940_vm3, %v1663_v8  ;;  %1531 = vmatprep.subr.bf16.mxu1 %v1672_v17  ;;  %p1712_p1 = scmp.lt.s32.totalorder %s2102_s26, %s1710_s0  ;;  %p1713_p2 = scmp.lt.s32.totalorder %s1711_s28, %s1705_s16 }
  0x26   : > { %1561 = vmatprep.mubr.msk.bf16.mxu0 %vm1784_vm2, %v1783_v1  ;;  %1570 = vmatpush3.bf16.msra.mxu0 %v1669_v14  ;;  %p1708_p0 = pneg %p1707_p13 }
  0x27   : > { %1524 = vmatmul.mubr.msk.bf16.gmra.mxu1 %vm561_vm1, %v1665_v10  ;;  %1571 = vmatprep.subr.bf16.mxu0 %v1783_v1  ;;  %p1714_p3 = por %p1713_p2, %p1712_p1 }
  0x28   : > { %1532 = vmatpush3.bf16.msra.mxu1 %v1672_v17 }
  0x29   : > { %1533 = vmatprep.subr.bf16.mxu1 %v1674_v19  ;;  %p1715_p5 = pnand %p1714_p3, %p1708_p0 }
  0x2a   : > { %1572 = vmatpush3.bf16.msra.mxu0 %v1671_v16 }
  0x2b   : > { %1573 = vmatprep.subr.bf16.mxu0 %v1783_v1 }
  0x2c   : > { %1534 = vmatpush3.bf16.msra.mxu1 %v1674_v19 }
  0x2d   : > { %1562 = vmatmul.mubr.msk.bf16.gmra.mxu0 %vm940_vm3, %v1666_v11  ;;  %1535 = vmatprep.subr.bf16.mxu1 %v1676_v21 }
  0x2e   : > { %1565 = vmatprep.mubr.msk.bf16.mxu0 %vm1784_vm2, %v1783_v1  ;;  %1574 = vmatpush3.bf16.msra.mxu0 %v1673_v18 }
  0x2f   : > { %1575 = vmatprep.subr.bf16.mxu0 %v1783_v1 }
  0x30   : > { %1536 = vmatpush3.bf16.msra.mxu1 %v1676_v21 }
  0x31   : > { %1537 = vmatprep.subr.bf16.mxu1 %v1678_v23 }
  0x32   : > { %1576 = vmatpush3.bf16.msra.mxu0 %v1675_v20 }
  0x33   : > { %1577 = vmatprep.subr.bf16.mxu0 %v1783_v1 }
  0x34   : > { %1538 = vmatpush3.bf16.msra.mxu1 %v1678_v23 }
  0x35   : > { %1566 = vmatmul.mubr.msk.bf16.gmra.mxu0 %vm940_vm3, %v1667_v12  ;;  %1539 = vmatprep.subr.bf16.mxu1 %v1680_v25 }
  0x36   : > { %1585 = vmatprep.mubr.msk.bf16.mxu0 %vm1784_vm2, %v1783_v1  ;;  %1578 = vmatpush3.bf16.msra.mxu0 %v1677_v22 }
  0x37   : > { %1579 = vmatprep.subr.bf16.mxu0 %v1783_v1 }
  0x38   : > { %1540 = vmatpush3.bf16.msra.mxu1 %v1680_v25 }
  0x39   : > { %1541 = vmatprep.subr.bf16.mxu1 %v1682_v27 }
  0x3a   : > { %1580 = vmatpush3.bf16.msra.mxu0 %v1679_v24 }
  0x3b   : > { %1581 = vmatprep.subr.bf16.mxu0 %v1783_v1 }
  0x3c   : > { %1542 = vmatpush3.bf16.msra.mxu1 %v1682_v27 }
  0x3e   : > { %1582 = vmatpush3.bf16.msra.mxu0 %v1681_v26 }
  0x3f   : > { %1583 = vmatprep.subr.bf16.mxu0 %v1783_v1 }
  0x42   : > { %1584 = vmatpush3.bf16.msra.mxu0 %v1683_v28 }
  0xdf   : > { %v1521_v29 = vpop.f32.mrf.mxu1 }
  0xe0   : > { %v621_v33 = vadd.f32 %v1521_v29, %v1420_v30 }
  0xe1   : > { %v612_v31 = vpop.f32.mrf.mxu1 }
  0xe2   : > { %v613_v37 = vadd.f32 %v1420_v30, %v612_v31 }
  0xe3   : > { %v1522_v34 = vpop.f32.mrf.mxu1 }
  0xe4   : > { %v624_v38 = vadd.f32 %v1522_v34, %v1420_v30 }
  0xe5   : > { %v984_v32 = vpop.f32.mrf.mxu0  ;;  %v615_v39 = vpop.f32.mrf.mxu1 }
  0xe6   : > { %v2006_v41 = vpack.c.bf16 %v624_v38, %v621_v33  ;;  %v985_v42 = vadd.f32 %v1449_v35, %v984_v32  ;;  %v616_v43 = vadd.f32 %v1420_v30, %v615_v39 }
  0xe7   : > { %v1559_v36 = vpop.f32.mrf.mxu0  ;;  %v1525_v45 = vpop.f32.mrf.mxu1 }
  0xe8   : > { %v648_v47 = vmul.bf16 %v2006_v41, %v2006_v41  ;;  %v2010_v48 = vpack.c.bf16 %v616_v43, %v613_v37  ;;  %v637_v54 = vadd.f32 %v1525_v45, %v1420_v30 }
  0xe9   : > { %v987_v40 = vpop.f32.mrf.mxu0  ;;  %v628_v50 = vpop.f32.mrf.mxu1 }
  0xea   : > { %v988_v44 = vadd.f32 %v1449_v35, %v987_v40  ;;  %v652_v52 = vmul.bf16 %v648_v47, %v2006_v41  ;;  %v647_v53 = vmul.bf16 %v2010_v48, %v2010_v48  ;;  %v629_v62 = vadd.f32 %v1420_v30, %v628_v50 }
  0xeb   : > { %v1560_v46 = vpop.f32.mrf.mxu0  ;;  %v1526_v56 = vpop.f32.mrf.mxu1 }
  0xec   : > { %v2012_v49 = vpack.c.bf16 %v988_v44, %v985_v42  ;;  %v656_v58 = vmul.bf16 1027030327, %v652_v52  ;;  %v651_v59 = vmul.bf16 %v647_v53, %v2010_v48  ;;  %v640_v61 = vadd.f32 %v1526_v56, %v1420_v30 }
  0xed   : > { %v992_v51 = vpop.f32.mrf.mxu0  ;;  %v631_v63 = vpop.f32.mrf.mxu1 }
  0xee   : > { %v1010_v55 = vmul.bf16 %v2012_v49, %v2012_v49  ;;  %v660_v2 = vadd.bf16 %v656_v58, %v2006_v41  ;;  %v655_v3 = vmul.bf16 1027030327, %v651_v59  ;;  %v2022_v5 = vpack.c.bf16 %v640_v61, %v637_v54 }
  0xef   : > { %v1563_v57 = vpop.f32.mrf.mxu0  ;;  %v993_v6 = vadd.f32 %v1449_v35, %v992_v51  ;;  %v632_v7 = vadd.f32 %v1420_v30, %v631_v63 }
  0xf0   : > { %v1013_v60 = vmul.bf16 %v1010_v55, %v2012_v49  ;;  %v664_v10 = vmul.bf16 1061961548, %v660_v2  ;;  %v659_v11 = vadd.bf16 %v655_v3, %v2010_v48  ;;  %v650_v13 = vmul.bf16 %v2022_v5, %v2022_v5 }
  0xf1   : > { %v995_v0 = vpop.f32.mrf.mxu0  ;;  %v2028_v14 = vpack.c.bf16 %v632_v7, %v629_v62 }
  0xf2   : > { %v1016_v4 = vmul.bf16 1027030327, %v1013_v60  ;;  %v996_v8 = vadd.f32 %v1449_v35, %v995_v0  ;;  %1691 = vtanh.bf16 %v664_v10  ;;  %v654_v18 = vmul.bf16 %v650_v13, %v2022_v5 }
  0xf3   : > { %v1564_v9 = vpop.f32.mrf.mxu0  ;;  %v649_v19 = vmul.bf16 %v2028_v14, %v2028_v14  ;;  %v663_v22 = vmul.bf16 1061961548, %v659_v11 }
  0xf4   : > { %v1019_v12 = vadd.bf16 %v1016_v4, %v2012_v49  ;;  %v2030_v15 = vpack.c.bf16 %v996_v8, %v993_v6  ;;  %v658_v23 = vmul.bf16 1027030327, %v654_v18 }
  0xf5   : > { %v1000_v16 = vpop.f32.mrf.mxu0  ;;  %v653_v24 = vmul.bf16 %v649_v19, %v2028_v14 }
  0xf6   : > { %v1022_v17 = vmul.bf16 1061961548, %v1019_v12  ;;  %v1011_v20 = vmul.bf16 %v2030_v15, %v2030_v15  ;;  %v662_v27 = vadd.bf16 %v658_v23, %v2022_v5  ;;  %v1001_v28 = vadd.f32 %v1449_v35, %v1000_v16 }
  0xf7   : > { %v1567_v21 = vpop.f32.mrf.mxu0  ;;  %v657_v30 = vmul.bf16 1027030327, %v653_v24 }
  0xf8   : > { %1693 = vtanh.bf16 %v1022_v17  ;;  %v1014_v25 = vmul.bf16 %v1011_v20, %v2030_v15  ;;  %v666_v34 = vmul.bf16 1061961548, %v662_v27  ;;  %v1686_v20 = vld [vmem:[%s2175_s2] sm:$0xff]  }
  0xf9   : > { %v1003_v26 = vpop.f32.mrf.mxu0  ;;  %1695 = vtanh.bf16 %v663_v22  ;;  %v661_v36 = vadd.bf16 %v657_v30, %v2028_v14 }
  0xfa   : > { %v1004_v29 = vadd.f32 %v1449_v35, %v1003_v26  ;;  %v1017_v31 = vmul.bf16 1027030327, %v1014_v25  ;;  %1697 = vtanh.bf16 %v666_v34 }
  0xfb   : > { %v1568_v32 = vpop.f32.mrf.mxu0  ;;  %v665_v39 = vmul.bf16 1061961548, %v661_v36  ;;  %v1687_v36 = vld [vmem:[%s2175_s2 + $0x18] sm:$0xff]  }
  0xfc   : > { %v1009_v33 = vpack.c.bf16 %v1004_v29, %v1001_v28  ;;  %v1020_v37 = vadd.bf16 %v1017_v31, %v2030_v15 }
  0xfd   : > { %1699 = vtanh.bf16 %v665_v39 }
  0xfe   : > { %v1012_v38 = vmul.bf16 %v1009_v33, %v1009_v33  ;;  %v1023_v40 = vmul.bf16 1061961548, %v1020_v37  ;;  %v1688_v37 = vld [vmem:[%s2158_s3 + $0x8] sm:$0xff]  }
 0x100   : > { %v1015_v42 = vmul.bf16 %v1012_v38, %v1009_v33  ;;  %1701 = vtanh.bf16 %v1023_v40  ;;  %v1692_v44 = vpop.eup %1691 }
 0x101   : > { %v672_v35 = vadd.bf16 1065369472, %v1692_v44  ;;  %v1689_v44 = vld [vmem:[%s2175_s2 + $0x10] sm:$0xff]  }
 0x102   : > { %v1018_v43 = vmul.bf16 1027030327, %v1015_v42 }
 0x103   : > { %v676_v53 = vmul.bf16 1056980736, %v672_v35 }
 0x104   : > { %v1021_v45 = vadd.bf16 %v1018_v43, %v1009_v33 }
 0x105   : > { %v680_v59 = vmul.bf16 %v676_v53, %v2006_v41 }
 0x106   : > { %v1694_v46 = vpop.eup %1693  ;;  %v1024_v47 = vmul.bf16 1061961548, %v1021_v45 }
 0x107   : > { %v1696_v50 = vpop.eup %1695  ;;  %v1028_v51 = vadd.bf16 1065369472, %v1694_v46 }
 0x108   : > { %v671_v52 = vadd.bf16 1065369472, %v1696_v50  ;;  %1703 = vtanh.bf16 %v1024_v47  ;;  %v1698_v57 = vpop.eup %1697 }
 0x109   : > { %v1031_v54 = vmul.bf16 1056980736, %v1028_v51  ;;  %v674_v60 = vadd.bf16 1065369472, %v1698_v57  ;;  %v1690_v57 = vld [vmem:[%s2158_s3 + $0x10] sm:$0xff]  }
 0x10a   : > { %v675_v55 = vmul.bf16 1056980736, %v671_v52 }
 0x10b   : > { %v1034_v56 = vmul.bf16 %v1031_v54, %v2012_v49  ;;  %v1700_v61 = vpop.eup %1699  ;;  %v678_v0 = vmul.bf16 1056980736, %v674_v60 }
 0x10c   : > { %v679_v58 = vmul.bf16 %v675_v55, %v2010_v48  ;;  %v673_v63 = vadd.bf16 1065369472, %v1700_v61 }
 0x10d   : > { %1586 = vmatmul.mubr.bf16.vlgmr.msra.gmra.mxu0 %v1034_v56  ;;  %v682_v48 = vmul.bf16 %v678_v0, %v2022_v5  ;;  %v1685_v5 = vld [vmem:[%s2158_s3] sm:$0xff]  }
 0x10e   : > { %1543 = vmatprep.mubr.bf16.mxu1 %v679_v58  ;;  %1589 = vmatprep.mubr.msk.bf16.mxu0 %vm1784_vm2, %v1783_v1  ;;  %v1702_v62 = vpop.eup %1701  ;;  %v677_v3 = vmul.bf16 1056980736, %v673_v63 }
 0x10f   : > { %1544 = vmatmul.mubr.bf16.vlgmr.msra.gmra.mxu1 %v680_v59  ;;  %v1029_v2 = vadd.bf16 1065369472, %v1702_v62 }
 0x110   : > { %v681_v49 = vmul.bf16 %v677_v3, %v2028_v14 }
 0x111   : > { %v1032_v4 = vmul.bf16 1056980736, %v1029_v2 }
 0x112   : > { %1547 = vmatprep.mubr.bf16.mxu1 %v681_v49 }
 0x113   : > { %v1035_v41 = vmul.bf16 %v1032_v4, %v2030_v15  ;;  %v1684_v15 = vld [vmem:[%s2175_s2 + $0x8] sm:$0xff]  }
 0x115   : > { %1590 = vmatmul.mubr.bf16.gmra.mxu0 %v1035_v41 }
 0x116   : > { %v1704_v6 = vpop.eup %1703  ;;  %1593 = vmatprep.mubr.msk.bf16.mxu0 %vm1784_vm2, %v1783_v1 }
 0x117   : > { %1548 = vmatmul.mubr.bf16.gmra.mxu1 %v682_v48  ;;  %v1030_v7 = vadd.bf16 1065369472, %v1704_v6 }
 0x119   : > { %v1033_v8 = vmul.bf16 1056980736, %v1030_v7 }
 0x11b   : > { %v1036_v9 = vmul.bf16 %v1033_v8, %v1009_v33 }
 0x11d   : > { %1594 = vmatmul.mubr.bf16.gmra.mxu0 %v1036_v9 }
 0x1cd   : > { %v1135_v10 = vpop.f32.mrf.mxu0 }
 0x1cf   : > { %v1545_v11 = vpop.f32.mrf.mxu1  ;;  %v1587_v12 = vpop.f32.mrf.mxu0 }
 0x1d1   : > { %v781_v13 = vpop.f32.mrf.mxu1  ;;  %v1138_v14 = vpop.f32.mrf.mxu0 }
 0x1d2   : > { %v1158_v16 = vpack.c.bf16 %v1138_v14, %v1135_v10 }
 0x1d3   : > { %v1546_v1 = vpop.f32.mrf.mxu1  ;;  %v1588_v17 = vpop.f32.mrf.mxu0 }
 0x1d4   : > { %v813_v18 = vpack.c.bf16 %v1546_v1, %v1545_v11  ;;  %v1185_v19 = vadd.bf16 %v1685_v5, %v1158_v16 }
 0x1d5   : > { %v784_v21 = vpop.f32.mrf.mxu1  ;;  %v1143_v27 = vpop.f32.mrf.mxu0 }
 0x1d6   : > { %v849_v22 = vadd.bf16 %v1684_v15, %v813_v18  ;;  %v1470_v23 = vcombine.low %v1185_v19, %v1185_v19  ;;  %v1471_v24 = vcombine.high %v1185_v19, %v1185_v19  ;;  %v812_v25 = vpack.c.bf16 %v784_v21, %v781_v13 }
 0x1d7   : > { %v1549_v26 = vpop.f32.mrf.mxu1  ;;  %v1591_v32 = vpop.f32.mrf.mxu0 }
 0x1d8   : > { %v1443_v28 = vcombine.low %v849_v22, %v849_v22  ;;  %v1444_v29 = vcombine.high %v849_v22, %v849_v22  ;;  %1209 = vst [vmem:[%s2069_s1] sm:$0xf] %v1470_v23  ;;  %1210 = vst [vmem:[%s2069_s1 + $0x4] sm:$0xf] %v1471_v24  ;;  %v848_v30 = vadd.bf16 %v1686_v20, %v812_v25 }
 0x1d9   : > { %v797_v31 = vpop.f32.mrf.mxu1  ;;  %v1146_v39 = vpop.f32.mrf.mxu0 }
 0x1da   : > { %882 = vst [vmem:[%s2073_s24 + $0x8] sm:$0xf] %v1443_v28  ;;  %883 = vst [vmem:[%s2073_s24 + $0xc] sm:$0xf] %v1444_v29  ;;  %v1441_v33 = vcombine.low %v848_v30, %v848_v30  ;;  %v1442_v34 = vcombine.high %v848_v30, %v848_v30  ;;  %v1159_v42 = vpack.c.bf16 %v1146_v39, %v1143_v27 }
 0x1db   : > { %v1550_v38 = vpop.f32.mrf.mxu1  ;;  %v1592_v45 = vpop.f32.mrf.mxu0 }
 0x1dc   : > { %880 = vst [vmem:[%s2073_s24] sm:$0xf] %v1441_v33  ;;  %881 = vst [vmem:[%s2073_s24 + $0x4] sm:$0xf] %v1442_v34  ;;  %v815_v40 = vpack.c.bf16 %v1550_v38, %v1549_v26  ;;  %v1186_v46 = vadd.bf16 %v1688_v37, %v1159_v42 }
 0x1dd   : > { %v800_v43 = vpop.f32.mrf.mxu1  ;;  %v1151_v50 = vpop.f32.mrf.mxu0 }
 0x1de   : > { %v851_v35 = vadd.bf16 %v1687_v36, %v815_v40  ;;  %v814_v47 = vpack.c.bf16 %v800_v43, %v797_v31  ;;  %v1472_v53 = vcombine.low %v1186_v46, %v1186_v46  ;;  %v1473_v54 = vcombine.high %v1186_v46, %v1186_v46 }
 0x1df   : > { %v1595_v56 = vpop.f32.mrf.mxu0 }
 0x1e0   : > { %v1447_v51 = vcombine.low %v851_v35, %v851_v35  ;;  %v1448_v52 = vcombine.high %v851_v35, %v851_v35  ;;  %v850_v55 = vadd.bf16 %v1689_v44, %v814_v47  ;;  %1211 = vst [vmem:[%s2069_s1 + $0x8] sm:$0xf] %v1472_v53  ;;  %1212 = vst [vmem:[%s2069_s1 + $0xc] sm:$0xf] %v1473_v54 }
 0x1e1   : > { %v1154_v60 = vpop.f32.mrf.mxu0 }
 0x1e2   : > { %886 = vst [vmem:[%s2073_s24 + $0x18] sm:$0xf] %v1447_v51  ;;  %887 = vst [vmem:[%s2073_s24 + $0x1c] sm:$0xf] %v1448_v52  ;;  %v1445_v58 = vcombine.low %v850_v55, %v850_v55  ;;  %v1446_v59 = vcombine.high %v850_v55, %v850_v55  ;;  %v1160_v61 = vpack.c.bf16 %v1154_v60, %v1151_v50 }
 0x1e3   : > { %v1596_v62 = vpop.f32.mrf.mxu0 }
 0x1e4   : > { %884 = vst [vmem:[%s2073_s24 + $0x10] sm:$0xf] %v1445_v58  ;;  %885 = vst [vmem:[%s2073_s24 + $0x14] sm:$0xf] %v1446_v59  ;;  %v1187_v63 = vadd.bf16 %v1690_v57, %v1160_v61 }
 0x1e5   : > { %1718 = shalt.err (!%p1715_p5)
}
 0x1e6   : > { %s1719_s13 = scalar_lea.hbm %s2100_s15, 512  ;;  %s1723_s12 = scalar_lea.hbm %s2165_s10, 1024 }
 0x1e7   : > { %p1720_p6 = scmp.ne.s32.totalorder %s2100_s15, %s1719_s13  ;;  %p1724_p10 = scmp.lt.s32.totalorder %s2100_s15, %s2165_s10 }
 0x1e8   : > { %p1725_p11 = scmp.lt.s32.totalorder %s1723_s12, %s1719_s13 }
 0x1e9   : > { %p1721_p7 = pnand %p1720_p6, %p1888_p4 }
 0x1ea   : > { %p1726_p12 = por %p1725_p11, %p1724_p10 }
 0x1eb   : > { %p1722_p9 = pneg %p1721_p7 }
 0x1ed   : > { %p1727_p13 = pnand %p1726_p12, %p1722_p9 }
 0x1ef   : > { %1730 = shalt.err (!%p1727_p13)
}
 0x1f0   : > { %s1786_s16 = smov 64   ;;  %s1787_s0 = smov 4   ;;  %v1474_v0 = vcombine.low %v1187_v63, %v1187_v63  ;;  %v1475_v2 = vcombine.high %v1187_v63, %v1187_v63 }
 0x1f1   : > { %1599 = dma.vmem_to_hbm [thread:$0]  (%p1888_p4), %s2102_s26, 512, %s2100_s15, %s2108_s14, %s1786_s16, %s1786_s16, %s1787_s0  }
 0x1f2   : > { %1213 = vst [vmem:[%s2069_s1 + $0x10] sm:$0xf] %v1474_v0  ;;  %1214 = vst [vmem:[%s2069_s1 + $0x14] sm:$0xf] %v1475_v2 }
 0x1f3 PF: > { %p1605_p0 = scmp.ge.s32.totalorder %s1781_s22, 2  ;;  %s1259_s2 = sand.u32 1, %s1761_s17  }
 0x1f4   : > { %s1260_s28 = scalar_lea.sflag [#allocation3], %s1259_s2 }
 0x1f5   : > { %p1602_p1 = pnand %p1605_p0, %p1895_p8 }
 0x1f7   : > { %p1603_p2 = pneg %p1602_p1 }
 0x1f9   : > { %1756 = dma.done.wait (%p1603_p2), %s1260_s28, 512  }
 0x1fa   : > { %1758 = vsyncadd (%p1603_p2), %s1260_s28, 4294966784  ;;  %s25_s22 = sadd.s32 1, %s1781_s22   ;;  %s2177_s17 = smov %s1765_s18 }
 0x1fb   : > { %p22_p3 = scmp.ge.s32.totalorder %s25_s22, 4   ;;  %s2178_s18 = smov %s1769_s19 }
 0x1fc   : > { %s2179_s19 = smov %s1901_s30  ;;  %s2180_s20 = smov %s1777_s21 }
 0x1fd   : > { %s2181_s21 = smov %s2183_s25  ;;  %24 = sbr.rel (!%p22_p3) target bundleno = 8 (0x8), region = 116 }
 0x202   :  { %1277 = vsyncpa [#allocation3], 1 }
 0x203   :  { %1279 = vsyncpa [#allocation3 + $0x1], 1 }

</bundles_post_ra>
